<compile_context>
chip_gen: v7x
topology: tpu7x:2x2x1
jax: 0.10.0
libtpu: 0.0.40
codegen_flags: <defaults>
</compile_context>

<pallas_src>
import functools

import jax
import jax.numpy as jnp
from jax.experimental import pallas as pl
from jax.experimental.pallas import tpu as pltpu


def _cdiv(a, b):
    return (a + b - 1) // b


def _round_up(x, m):
    return _cdiv(x, m) * m


def _pick_tm(n, mult):
    """Choose #grid-steps first (targeting ~1024-row tiles), then the smallest
    tile (multiple of `mult`) covering n in that many steps.  Avoids tiny tiles
    for small N and large row padding for awkward N (e.g. N=1000 -> one 1000-row
    tile, N=2050 -> 3 x 688)."""
    target = 1024
    g = max(1, _cdiv(n, target))
    tm = _round_up(_cdiv(n, g), mult)
    return int(min(tm, _round_up(target, mult)))


def _fused_mlp_kernel(*refs, depth, store_dtype):
    # refs = (x, w0, b0, w1, b1, ..., w_{L-1}, b_{L-1}, out)
    x_ref = refs[0]
    o_ref = refs[-1]
    h = x_ref[...].astype(jnp.float32)              # (tm, d_in_pad)
    for l in range(depth):                          # static unroll: depth small
        w = refs[1 + 2 * l][...]                    # (K_pad, N_pad) store_dtype
        b = refs[2 + 2 * l][...]                    # (1, N_pad) f32
        y = jnp.dot(h.astype(store_dtype), w,
                    preferred_element_type=jnp.float32)
        y = y + b
        if l != depth - 1:
            y = jnp.tanh(y)                         # tanh in f32 (v5e-safe)
        h = y
    o_ref[...] = h.astype(o_ref.dtype)


def fused_mlp(x, w_list, b_list, *, d_in_pad, d_out, store_dtype, sub_mult,
              tm=None):
    """Runs the whole padded MLP in a single pallas_call; returns (n, d_out)."""
    n, d_in = x.shape
    depth = len(w_list)
    d_out_pad = int(w_list[-1].shape[1])
    dsize = jnp.dtype(store_dtype).itemsize

    if tm is None:
        tm = _pick_tm(n, sub_mult)
    n_pad = _round_up(n, tm)

    # One cheap pad of the NARROW input (rows -> n_pad, features -> d_in_pad).
    x_p = x.astype(store_dtype)
    if (n_pad, d_in_pad) != (n, d_in):
        x_p = jnp.pad(x_p, ((0, n_pad - n), (0, d_in_pad - d_in)))

    # ---- VMEM budget (explicit; v5e scoped default is only 16 MiB, v7x has
    # ---- 64 MiB physical per TensorCore) ----
    weight_bytes = sum(int(w.size) * dsize for w in w_list) \
        + sum(int(b.size) * 4 for b in b_list)
    io_bytes = tm * d_in_pad * dsize + tm * d_out_pad * dsize
    max_hidden = max(int(w.shape[1]) for w in w_list)
    act_scratch = 4 * tm * max_hidden * 4            # f32 intermediates / spills
    vmem_needed = 2 * weight_bytes + 2 * io_bytes + act_scratch
    assert vmem_needed < 56 * 1024 * 1024, (
        "resident-weight strategy exceeds per-core VMEM; stream weights per "
        "layer instead (see TODO)")
    vmem_limit = int(min(64 * 1024 * 1024,
                         max(vmem_needed + 8 * 1024 * 1024, 32 * 1024 * 1024)))

    # ---- cost estimate ----
    flops = 2 * n_pad * sum(int(w.shape[0]) * int(w.shape[1]) for w in w_list)
    transcendentals = n_pad * sum(int(w.shape[1]) for w in w_list[:-1])
    bytes_accessed = (n_pad * d_in_pad + n_pad * d_out_pad) * dsize + weight_bytes

    in_specs = [pl.BlockSpec((tm, d_in_pad), lambda i: (i, 0))]
    operands = [x_p]
    for w, b in zip(w_list, b_list):
        # constant block index -> weights/biases stay resident in VMEM
        in_specs.append(pl.BlockSpec(tuple(w.shape), lambda i: (0, 0)))
        in_specs.append(pl.BlockSpec(tuple(b.shape), lambda i: (0, 0)))
        operands += [w, b]

    kernel = functools.partial(_fused_mlp_kernel, depth=depth,
                               store_dtype=store_dtype)
    out = pl.pallas_call(
        kernel,
        out_shape=jax.ShapeDtypeStruct((n_pad, d_out_pad), store_dtype),
        grid_spec=pltpu.PrefetchScalarGridSpec(
            num_scalar_prefetch=0,
            grid=(n_pad // tm,),
            in_specs=in_specs,
            out_specs=pl.BlockSpec((tm, d_out_pad), lambda i: (i, 0)),
        ),
        compiler_params=pltpu.CompilerParams(
            dimension_semantics=("parallel",),
            vmem_limit_bytes=vmem_limit,
        ),
        cost_estimate=pl.CostEstimate(
            flops=int(flops),
            transcendentals=int(transcendentals),
            bytes_accessed=int(bytes_accessed),
        ),
    )(*operands)
    return out[:n, :d_out]


class DNNPallas:
    """Pallas port of the PyTorch DNN: Linear+Tanh stack, last Linear has no act."""

    def __init__(self, layers, key, dtype=jnp.float32):
        self.layers_sizes = list(layers)
        self.depth = len(layers) - 1
        assert self.depth >= 1
        self.d_in, self.d_out = layers[0], layers[-1]
        self.store_dtype = jnp.dtype(dtype)
        # sublane multiple: 8 for f32 storage, 16 for bf16 storage
        self.sub_mult = 8 if self.store_dtype == jnp.dtype(jnp.float32) else 16

        # padded widths: input -> sublane multiple, hidden -> 128 (lane-dense),
        # output -> multiple of 8 (narrow HBM writeback, masked stores)
        widths_pad = [_round_up(layers[0], self.sub_mult)]
        for w in layers[1:-1]:
            widths_pad.append(_round_up(w, 128))
        widths_pad.append(_round_up(layers[-1], 8))
        self.widths_pad = widths_pad

        self.params = []          # unpadded f32, for the pure-JAX reference
        self.w_pad, self.b_pad = [], []
        for i in range(self.depth):
            fan_in, fan_out = layers[i], layers[i + 1]
            key, kw, kb = jax.random.split(key, 3)
            # matches torch.nn.Linear default init: U(-1/sqrt(fan_in), 1/sqrt(fan_in))
            bound = 1.0 / (fan_in ** 0.5)
            w = jax.random.uniform(kw, (fan_in, fan_out), jnp.float32, -bound, bound)
            b = jax.random.uniform(kb, (fan_out,), jnp.float32, -bound, bound)
            self.params.append((w, b))
            wp = jnp.zeros((widths_pad[i], widths_pad[i + 1]), self.store_dtype)
            wp = wp.at[:fan_in, :fan_out].set(w.astype(self.store_dtype))
            bp = jnp.zeros((1, widths_pad[i + 1]), jnp.float32)   # bias stays f32
            bp = bp.at[0, :fan_out].set(b)
            self.w_pad.append(wp)
            self.b_pad.append(bp)

    def __call__(self, x):
        n, d_in = x.shape
        assert d_in == self.d_in
        return fused_mlp(x, self.w_pad, self.b_pad,
                         d_in_pad=self.widths_pad[0],
                         d_out=self.d_out,
                         store_dtype=self.store_dtype,
                         sub_mult=self.sub_mult)


def _reference_forward(x, params):
    out = x
    for i, (w, b) in enumerate(params):
        out = out @ w + b
        if i != len(params) - 1:
            out = jnp.tanh(out)
    return out


if __name__ == "__main__":
    # Typical PINN-style DNN: layers = [3, 32, 32, 32, 2]
    layers = [3, 32, 32, 32, 2]

    key = jax.random.PRNGKey(0)
    key, kx, kx2, kp = jax.random.split(key, 4)

    model = DNNPallas(layers, kp)                      # f32 storage

    # --- small batch: single grid step (no forced 2-way split) ---
    x = jax.random.normal(kx, (64, layers[0]), dtype=jnp.float32)
    out = jax.block_until_ready(model(x))
    ref = _reference_forward(x, model.params)
    assert out.shape == (64, layers[-1])
    assert jnp.allclose(out, ref, atol=1e-5, rtol=1e-5)

    # --- awkward batch: exercises multi-step grid + minimal row padding ---
    x_big = jax.random.normal(kx2, (2050, layers[0]), dtype=jnp.float32)
    out_big = jax.block_until_ready(model(x_big))
    ref_big = _reference_forward(x_big, model.params)
    assert out_big.shape == (2050, layers[-1])
    assert jnp.allclose(out_big, ref_big, atol=1e-5, rtol=1e-5)

    # --- bf16 storage / f32 accumulation path ---
    model_bf16 = DNNPallas(layers, kp, dtype=jnp.bfloat16)
    out_bf = jax.block_until_ready(model_bf16(x)).astype(jnp.float32)
    assert jnp.allclose(out_bf, ref, atol=5e-2, rtol=5e-2)

    print("KERNEL_OK")
</pallas_src>

<mosaic_0001>
module attributes {stable_mosaic.version = 11 : i64} {
  func.func @_fused_mlp_kernel(%arg0: i32, %arg1: memref<64x8xf32, #tpu.memory_space<vmem>>, %arg2: memref<8x128xf32, #tpu.memory_space<vmem>>, %arg3: memref<1x128xf32, #tpu.memory_space<vmem>>, %arg4: memref<128x128xf32, #tpu.memory_space<vmem>>, %arg5: memref<1x128xf32, #tpu.memory_space<vmem>>, %arg6: memref<128x128xf32, #tpu.memory_space<vmem>>, %arg7: memref<1x128xf32, #tpu.memory_space<vmem>>, %arg8: memref<128x8xf32, #tpu.memory_space<vmem>>, %arg9: memref<1x8xf32, #tpu.memory_space<vmem>>, %arg10: memref<64x8xf32, #tpu.memory_space<vmem>>) attributes {dimension_semantics = [#tpu.dimension_semantics<parallel>], iteration_bounds = array<i64: 1>, scalar_prefetch = 0 : i64, scratch_operands = 0 : i64, tpu.core_type = #tpu.core_type<tc>, window_params = [{transform_indices = @transform_0, window_bounds = array<i64: 64, 8>}, {pipeline_mode = #tpu.pipeline_mode<synchronous>, transform_indices = @transform_1, window_bounds = array<i64: 8, 128>}, {pipeline_mode = #tpu.pipeline_mode<synchronous>, transform_indices = @transform_2, window_bounds = array<i64: 1, 128>}, {pipeline_mode = #tpu.pipeline_mode<synchronous>, transform_indices = @transform_3, window_bounds = array<i64: 128, 128>}, {pipeline_mode = #tpu.pipeline_mode<synchronous>, transform_indices = @transform_4, window_bounds = array<i64: 1, 128>}, {pipeline_mode = #tpu.pipeline_mode<synchronous>, transform_indices = @transform_5, window_bounds = array<i64: 128, 128>}, {pipeline_mode = #tpu.pipeline_mode<synchronous>, transform_indices = @transform_6, window_bounds = array<i64: 1, 128>}, {pipeline_mode = #tpu.pipeline_mode<synchronous>, transform_indices = @transform_7, window_bounds = array<i64: 128, 8>}, {pipeline_mode = #tpu.pipeline_mode<synchronous>, transform_indices = @transform_8, window_bounds = array<i64: 1, 8>}, {transform_indices = @transform_9, window_bounds = array<i64: 64, 8>}]} {
    %c0 = arith.constant 0 : index
    %c0_0 = arith.constant 0 : index
    %0 = vector.load %arg1[%c0, %c0_0] : memref<64x8xf32, #tpu.memory_space<vmem>>, vector<64x8xf32>
    %c0_1 = arith.constant 0 : index
    %c0_2 = arith.constant 0 : index
    %1 = vector.load %arg2[%c0_1, %c0_2] : memref<8x128xf32, #tpu.memory_space<vmem>>, vector<8x128xf32>
    %c0_3 = arith.constant 0 : index
    %c0_4 = arith.constant 0 : index
    %2 = vector.load %arg3[%c0_3, %c0_4] : memref<1x128xf32, #tpu.memory_space<vmem>>, vector<1x128xf32>
    %cst = arith.constant dense<0.000000e+00> : vector<64x128xf32>
    %3 = tpu.matmul %0, %1, %cst {dimension_numbers = #tpu.dot_dimension_numbers<[1], [0], [0], [1], [0, 0, 1, 1], [], []>} : vector<64x8xf32>, vector<8x128xf32>, vector<64x128xf32> -> vector<64x128xf32>
    %4 = vector.broadcast %2 : vector<1x128xf32> to vector<64x128xf32>
    %5 = arith.addf %3, %4 : vector<64x128xf32>
    %6 = math.tanh %5 : vector<64x128xf32>
    %c0_5 = arith.constant 0 : index
    %c0_6 = arith.constant 0 : index
    %7 = vector.load %arg4[%c0_5, %c0_6] : memref<128x128xf32, #tpu.memory_space<vmem>>, vector<128x128xf32>
    %c0_7 = arith.constant 0 : index
    %c0_8 = arith.constant 0 : index
    %8 = vector.load %arg5[%c0_7, %c0_8] : memref<1x128xf32, #tpu.memory_space<vmem>>, vector<1x128xf32>
    %cst_9 = arith.constant dense<0.000000e+00> : vector<64x128xf32>
    %9 = tpu.matmul %6, %7, %cst_9 {dimension_numbers = #tpu.dot_dimension_numbers<[1], [0], [0], [1], [0, 0, 1, 1], [], []>} : vector<64x128xf32>, vector<128x128xf32>, vector<64x128xf32> -> vector<64x128xf32>
    %10 = vector.broadcast %8 : vector<1x128xf32> to vector<64x128xf32>
    %11 = arith.addf %9, %10 : vector<64x128xf32>
    %12 = math.tanh %11 : vector<64x128xf32>
    %c0_10 = arith.constant 0 : index
    %c0_11 = arith.constant 0 : index
    %13 = vector.load %arg6[%c0_10, %c0_11] : memref<128x128xf32, #tpu.memory_space<vmem>>, vector<128x128xf32>
    %c0_12 = arith.constant 0 : index
    %c0_13 = arith.constant 0 : index
    %14 = vector.load %arg7[%c0_12, %c0_13] : memref<1x128xf32, #tpu.memory_space<vmem>>, vector<1x128xf32>
    %cst_14 = arith.constant dense<0.000000e+00> : vector<64x128xf32>
    %15 = tpu.matmul %12, %13, %cst_14 {dimension_numbers = #tpu.dot_dimension_numbers<[1], [0], [0], [1], [0, 0, 1, 1], [], []>} : vector<64x128xf32>, vector<128x128xf32>, vector<64x128xf32> -> vector<64x128xf32>
    %16 = vector.broadcast %14 : vector<1x128xf32> to vector<64x128xf32>
    %17 = arith.addf %15, %16 : vector<64x128xf32>
    %18 = math.tanh %17 : vector<64x128xf32>
    %c0_15 = arith.constant 0 : index
    %c0_16 = arith.constant 0 : index
    %19 = vector.load %arg8[%c0_15, %c0_16] : memref<128x8xf32, #tpu.memory_space<vmem>>, vector<128x8xf32>
    %c0_17 = arith.constant 0 : index
    %c0_18 = arith.constant 0 : index
    %20 = vector.load %arg9[%c0_17, %c0_18] : memref<1x8xf32, #tpu.memory_space<vmem>>, vector<1x8xf32>
    %cst_19 = arith.constant dense<0.000000e+00> : vector<64x8xf32>
    %21 = tpu.matmul %18, %19, %cst_19 {dimension_numbers = #tpu.dot_dimension_numbers<[1], [0], [0], [1], [0, 0, 1, 1], [], []>} : vector<64x128xf32>, vector<128x8xf32>, vector<64x8xf32> -> vector<64x8xf32>
    %22 = vector.broadcast %20 : vector<1x8xf32> to vector<64x8xf32>
    %23 = arith.addf %21, %22 : vector<64x8xf32>
    %c0_20 = arith.constant 0 : index
    %c0_21 = arith.constant 0 : index
    %24 = vector.load %arg10[%c0_20, %c0_21] : memref<64x8xf32, #tpu.memory_space<vmem>>, vector<64x8xf32>
    tpu.vector_store %arg10[%c0_20, %c0_21], %23 {strides = array<i32>} : memref<64x8xf32, #tpu.memory_space<vmem>>, vector<64x8xf32>,
    return
  }
  func.func @transform_0(%arg0: i32) -> (i32, i32) {
    %c0_i32 = arith.constant 0 : i32
    %c0_i32_0 = arith.constant 0 : i32
    return %arg0, %c0_i32 : i32, i32
  }
  func.func @transform_1(%arg0: i32) -> (i32, i32) {
    %c0_i32 = arith.constant 0 : i32
    %c0_i32_0 = arith.constant 0 : i32
    %c0_i32_1 = arith.constant 0 : i32
    return %c0_i32, %c0_i32_0 : i32, i32
  }
  func.func @transform_2(%arg0: i32) -> (i32, i32) {
    %c0_i32 = arith.constant 0 : i32
    %c0_i32_0 = arith.constant 0 : i32
    %c0_i32_1 = arith.constant 0 : i32
    return %c0_i32, %c0_i32_0 : i32, i32
  }
  func.func @transform_3(%arg0: i32) -> (i32, i32) {
    %c0_i32 = arith.constant 0 : i32
    %c0_i32_0 = arith.constant 0 : i32
    %c0_i32_1 = arith.constant 0 : i32
    return %c0_i32, %c0_i32_0 : i32, i32
  }
  func.func @transform_4(%arg0: i32) -> (i32, i32) {
    %c0_i32 = arith.constant 0 : i32
    %c0_i32_0 = arith.constant 0 : i32
    %c0_i32_1 = arith.constant 0 : i32
    return %c0_i32, %c0_i32_0 : i32, i32
  }
  func.func @transform_5(%arg0: i32) -> (i32, i32) {
    %c0_i32 = arith.constant 0 : i32
    %c0_i32_0 = arith.constant 0 : i32
    %c0_i32_1 = arith.constant 0 : i32
    return %c0_i32, %c0_i32_0 : i32, i32
  }
  func.func @transform_6(%arg0: i32) -> (i32, i32) {
    %c0_i32 = arith.constant 0 : i32
    %c0_i32_0 = arith.constant 0 : i32
    %c0_i32_1 = arith.constant 0 : i32
    return %c0_i32, %c0_i32_0 : i32, i32
  }
  func.func @transform_7(%arg0: i32) -> (i32, i32) {
    %c0_i32 = arith.constant 0 : i32
    %c0_i32_0 = arith.constant 0 : i32
    %c0_i32_1 = arith.constant 0 : i32
    return %c0_i32, %c0_i32_0 : i32, i32
  }
  func.func @transform_8(%arg0: i32) -> (i32, i32) {
    %c0_i32 = arith.constant 0 : i32
    %c0_i32_0 = arith.constant 0 : i32
    %c0_i32_1 = arith.constant 0 : i32
    return %c0_i32, %c0_i32_0 : i32, i32
  }
  func.func @transform_9(%arg0: i32) -> (i32, i32) {
    %c0_i32 = arith.constant 0 : i32
    %c0_i32_0 = arith.constant 0 : i32
    return %arg0, %c0_i32 : i32, i32
  }
}

</mosaic_0001>

<bundles_post_ra>
// kernel: tpu_custom_call.1
= control target key start
LH: loop header
LB: loop body
LE: loop exit
PB: predicated region body
PF: predicated region fallthrough
CT: control target
= control target key end

     0   :  { %14 = vsyncpa [#allocation3], 0  ;;  %s1039_s30 = smov [#allocation2]   ;;  %s1279_s0 = inlined_call_operand.vmem [shape: f32[64,8], index: 0, kind: input, shape index: {}]   ;;  %s1280_s1 = inlined_call_operand.vmem [shape: f32[8,128], index: 1, kind: input, shape index: {}]   ;;  %s1281_s2 = inlined_call_operand.vmem [shape: f32[1,128], index: 2, kind: input, shape index: {}]   ;;  %s1282_s3 = inlined_call_operand.vmem [shape: f32[128,128], index: 3, kind: input, shape index: {}]   ;;  %s1283_s4 = inlined_call_operand.vmem [shape: f32[1,128], index: 4, kind: input, shape index: {}]   ;;  %s1284_s5 = inlined_call_operand.hbm [shape: f32[128,128], index: 5, kind: input, shape index: {}]   ;;  %s1285_s6 = inlined_call_operand.vmem [shape: f32[1,128], index: 6, kind: input, shape index: {}]   ;;  %s1286_s7 = inlined_call_operand.vmem [shape: f32[128,8], index: 7, kind: input, shape index: {}]   ;;  %s1287_s8 = inlined_call_operand.vmem [shape: f32[1,8], index: 8, kind: input, shape index: {}]   ;;  %s1288_s9 = inlined_call_operand.vmem [shape: f32[64,8], index: 9, kind: output, shape index: {}]  }
   0x1   :  { %s30_s10 = sshll.u32 %s1039_s30, 4  ;;  %s1015_s13 = scalar_lea.hbm %s1284_s5, 2048  ;;  %s31_s10 = int_to_ptr.vmem [resolvable:$true] %s30_s10 }
   0x2   :  { %p1016_p0 = scmp.ne.s32.totalorder %s1284_s5, %s1015_s13  ;;  %p1019_p1 = scmp.lt.u32.totalorder %s1015_s13, %s1284_s5 }
   0x4   :  { %p1021_p2 = pnand %p1019_p1, %p1016_p0 }
   0x6   :  { %1024 = shalt.err (!%p1021_p2)
}
   0x7   :  { %s1025_s18 = scalar_lea.vmem %s31_s10, 2048  ;;  %p1030_p4 = scmp.lt.s32.totalorder %s31_s10, %s31_s10 }
   0x8   :  { %p1026_p3 = scmp.ne.s32.totalorder %s31_s10, %s1025_s18  ;;  %p1031_p5 = scmp.lt.s32.totalorder %s1025_s18, %s1025_s18 }
   0xa   :  { %p1032_p6 = por %p1031_p5, %p1030_p4 }
   0xc   :  { %p1033_p7 = pnand %p1032_p6, %p1026_p3 }
   0xe   :  { %1036 = shalt.err (!%p1033_p7)
}
   0xf   :  { %s1040_s19 = smov 128   ;;  %s1041_s20 = smov 8  }
  0x10   :  { %36 = dma.hbm_to_vmem [thread:$0]  %s1284_s5, 2048, %s31_s10, [#allocation3], %s1040_s19, %s1040_s19, %s1041_s20  }
  0x11   :  { %1037 = dma.done.wait [#allocation3], 2048  }
  0x12   :  { %1038 = vsyncadd [#allocation3], 4294965248  ;;  %vm62_vm0 = vcmask 64512   ;;  %v54_v0 = vld [vmem:[%s1280_s1] sm:$0xff]  ;;  %v47_v2 = vld [vmem:[%s1279_s0 + $0x8] sm:$0xff] }
  0x13   :  { %v46_v1 = vld [vmem:[%s1279_s0] sm:$0xff]  ;;  %706 = vmatprep.subr.mxu0 %v54_v0  ;;  %v48_v3 = vld [vmem:[%s1279_s0 + $0x10] sm:$0xff]  ;;  %v201_v5 = vld [vmem:[%s1282_s3 + $0x8] sm:$0xff] }
  0x14   :  { %708 = vmatprep.mubr.msk.f32.mxu0 %vm62_vm0, %v46_v1  ;;  %707 = vmatpush3.msra.mxu0 %v54_v0  ;;  %v200_v4 = vld [vmem:[%s1282_s3] sm:$0xff]  ;;  %v202_v6 = vld [vmem:[%s1282_s3 + $0x10] sm:$0xff]  ;;  %v49_v7 = vld [vmem:[%s1279_s0 + $0x18] sm:$0xff] }
  0x15   :  { %709 = vmatmul.mubr.msk.f32.vlgmr.msra.gmra.mrb[0].mxu0 %vm62_vm0, %v47_v2  ;;  %v852_v8 = vpack.c.bf16 %v201_v5, %v200_v4  ;;  %v203_v9 = vld [vmem:[%s1282_s3 + $0x18] sm:$0xff]  ;;  %v50_v10 = vld [vmem:[%s1279_s0 + $0x20] sm:$0xff]  ;;  %v205_v13 = vld [vmem:[%s1282_s3 + $0x28] sm:$0xff] }
  0x16   :  { %711 = vmatprep.mubr.msk.f32.mxu0 %vm62_vm0, %v48_v3  ;;  %v856_v11 = vpack.c.bf16 %v203_v9, %v202_v6  ;;  %v204_v12 = vld [vmem:[%s1282_s3 + $0x20] sm:$0xff]  ;;  %v51_v14 = vld [vmem:[%s1279_s0 + $0x28] sm:$0xff]  ;;  %v52_v16 = vld [vmem:[%s1279_s0 + $0x30] sm:$0xff] }
  0x17   :  { %853 = vmatprep.subr.bf16.mxu1 %v852_v8  ;;  %v860_v15 = vpack.c.bf16 %v205_v13, %v204_v12  ;;  %v206_v17 = vld [vmem:[%s1282_s3 + $0x30] sm:$0xff]  ;;  %v207_v18 = vld [vmem:[%s1282_s3 + $0x38] sm:$0xff]  ;;  %v208_v21 = vld [vmem:[%s1282_s3 + $0x40] sm:$0xff] }
  0x18   :  { %855 = vmatpush3.bf16.msra.mxu1 %v852_v8  ;;  %v53_v19 = vld [vmem:[%s1279_s0 + $0x38] sm:$0xff]  ;;  %v864_v20 = vpack.c.bf16 %v207_v18, %v206_v17  ;;  %v209_v22 = vld [vmem:[%s1282_s3 + $0x48] sm:$0xff]  ;;  %v210_v24 = vld [vmem:[%s1282_s3 + $0x50] sm:$0xff] }
  0x19   :  { %712 = vmatmul.mubr.msk.f32.gmra.mrb[2].mxu0 %vm62_vm0, %v49_v7  ;;  %857 = vmatprep.subr.bf16.mxu1 %v856_v11  ;;  %v868_v23 = vpack.c.bf16 %v209_v22, %v208_v21  ;;  %v211_v25 = vld [vmem:[%s1282_s3 + $0x58] sm:$0xff]  ;;  %v212_v27 = vld [vmem:[%s1282_s3 + $0x60] sm:$0xff]  ;;  %v213_v28 = vld [vmem:[%s1282_s3 + $0x68] sm:$0xff] }
  0x1a   :  { %714 = vmatprep.mubr.msk.f32.mxu0 %vm62_vm0, %v50_v10  ;;  %v872_v26 = vpack.c.bf16 %v211_v25, %v210_v24  ;;  %v876_v29 = vpack.c.bf16 %v213_v28, %v212_v27  ;;  %v214_v30 = vld [vmem:[%s1282_s3 + $0x70] sm:$0xff]  ;;  %v215_v31 = vld [vmem:[%s1282_s3 + $0x78] sm:$0xff]  ;;  %v336_v33 = vld [vmem:[#allocation2] sm:$0xff] }
  0x1b   :  { %v880_v32 = vpack.c.bf16 %v215_v31, %v214_v30  ;;  %v337_v34 = vld [vmem:[#allocation2 + $0x8] sm:$0xff]  ;;  %v338_v35 = vld [vmem:[#allocation2 + $0x10] sm:$0xff]  ;;  %v339_v37 = vld [vmem:[#allocation2 + $0x18] sm:$0xff] }
  0x1c   :  { %859 = vmatpush3.bf16.msra.mxu1 %v856_v11  ;;  %v884_v36 = vpack.c.bf16 %v337_v34, %v336_v33  ;;  %v888_v38 = vpack.c.bf16 %v339_v37, %v338_v35  ;;  %v340_v39 = vld [vmem:[#allocation2 + $0x20] sm:$0xff]  ;;  %v341_v40 = vld [vmem:[#allocation2 + $0x28] sm:$0xff]  ;;  %v342_v42 = vld [vmem:[#allocation2 + $0x30] sm:$0xff] }
  0x1d   :  { %715 = vmatmul.mubr.msk.f32.gmra.mrb[4].mxu0 %vm62_vm0, %v51_v14  ;;  %861 = vmatprep.subr.bf16.mxu1 %v860_v15  ;;  %v892_v41 = vpack.c.bf16 %v341_v40, %v340_v39  ;;  %v343_v43 = vld [vmem:[#allocation2 + $0x38] sm:$0xff]  ;;  %v613_v45 = vld [vmem:[%s1281_s2] ss:$0 sm:$0xff]  ;;  %v345_v7 = vld [vmem:[#allocation2 + $0x48] sm:$0xff] }
  0x1e   :  { %717 = vmatprep.mubr.msk.f32.mxu0 %vm62_vm0, %v52_v16  ;;  %885 = vmatprep.subr.bf16.mxu0 %v884_v36  ;;  %v896_v44 = vpack.c.bf16 %v343_v43, %v342_v42  ;;  %v344_v6 = vld [vmem:[#allocation2 + $0x40] sm:$0xff]  ;;  %v346_v9 = vld [vmem:[#allocation2 + $0x50] sm:$0xff]  ;;  %v347_v10 = vld [vmem:[#allocation2 + $0x58] sm:$0xff] }
  0x1f   :  { %887 = vmatpush3.bf16.msra.mxu0 %v884_v36  ;;  %v900_v8 = vpack.c.bf16 %v345_v7, %v344_v6  ;;  %v904_v11 = vpack.c.bf16 %v347_v10, %v346_v9  ;;  %v348_v12 = vld [vmem:[#allocation2 + $0x60] sm:$0xff]  ;;  %v349_v13 = vld [vmem:[#allocation2 + $0x68] sm:$0xff]  ;;  %v351_v16 = vld [vmem:[#allocation2 + $0x78] sm:$0xff] }
  0x20   :  { %863 = vmatpush3.bf16.msra.mxu1 %v860_v15  ;;  %889 = vmatprep.subr.bf16.mxu0 %v888_v38  ;;  %v908_v14 = vpack.c.bf16 %v349_v13, %v348_v12  ;;  %v350_v15 = vld [vmem:[#allocation2 + $0x70] sm:$0xff]  ;;  %v472_v18 = vld [vmem:[%s1286_s7] sm:$0xff]  ;;  %v475_v22 = vld [vmem:[%s1286_s7 + $0x18] sm:$0xff] }
  0x21   :  { %718 = vmatmul.mubr.msk.f32.gmra.mrb[6].mxu0 %vm62_vm0, %v53_v19  ;;  %865 = vmatprep.subr.bf16.mxu1 %v864_v20  ;;  %v912_v17 = vpack.c.bf16 %v351_v16, %v350_v15  ;;  %v473_v19 = vld [vmem:[%s1286_s7 + $0x8] sm:$0xff]  ;;  %v476_v24 = vld [vmem:[%s1286_s7 + $0x20] sm:$0xff]  ;;  %v478_v27 = vld [vmem:[%s1286_s7 + $0x30] sm:$0xff] }
  0x22   :  { %v916_v21 = vpack.c.bf16 %v473_v19, %v472_v18  ;;  %v477_v25 = vld [vmem:[%s1286_s7 + $0x28] sm:$0xff]  ;;  %v479_v28 = vld [vmem:[%s1286_s7 + $0x38] sm:$0xff]  ;;  %v622_v30 = vld [vmem:[%s1283_s4] ss:$0 sm:$0xff] }
  0x23   :  { %891 = vmatpush3.bf16.msra.mxu0 %v888_v38 }
  0x24   :  { %867 = vmatpush3.bf16.msra.mxu1 %v864_v20  ;;  %893 = vmatprep.subr.bf16.mxu0 %v892_v41  ;;  %v474_v20 = vld [vmem:[%s1286_s7 + $0x10] sm:$0xff] }
  0x25   :  { %869 = vmatprep.subr.bf16.mxu1 %v868_v23 }
  0x27   :  { %895 = vmatpush3.bf16.msra.mxu0 %v892_v41 }
  0x28   :  { %871 = vmatpush3.bf16.msra.mxu1 %v868_v23  ;;  %897 = vmatprep.subr.bf16.mxu0 %v896_v44  ;;  %v920_v23 = vpack.c.bf16 %v475_v22, %v474_v20 }
  0x29   :  { %873 = vmatprep.subr.bf16.mxu1 %v872_v26 }
  0x2b   :  { %899 = vmatpush3.bf16.msra.mxu0 %v896_v44 }
  0x2c   :  { %875 = vmatpush3.bf16.msra.mxu1 %v872_v26  ;;  %901 = vmatprep.subr.bf16.mxu0 %v900_v8  ;;  %v924_v26 = vpack.c.bf16 %v477_v25, %v476_v24 }
  0x2d   :  { %877 = vmatprep.subr.bf16.mxu1 %v876_v29 }
  0x2f   :  { %903 = vmatpush3.bf16.msra.mxu0 %v900_v8 }
  0x30   :  { %879 = vmatpush3.bf16.msra.mxu1 %v876_v29  ;;  %905 = vmatprep.subr.bf16.mxu0 %v904_v11  ;;  %v928_v29 = vpack.c.bf16 %v479_v28, %v478_v27  ;;  %v624_v28 = vld [vmem:[%s1287_s8] ss:$0 sm:$0xff] }
  0x31   :  { %881 = vmatprep.subr.bf16.mxu1 %v880_v32 }
  0x33   :  { %907 = vmatpush3.bf16.msra.mxu0 %v904_v11 }
  0x34   :  { %883 = vmatpush3.bf16.msra.mxu1 %v880_v32  ;;  %909 = vmatprep.subr.bf16.mxu0 %v908_v14 }
  0x35   :  { %948 = vmatprep.subr.bf16.mxu1 %v916_v21 }
  0x37   :  { %911 = vmatpush3.bf16.msra.mxu0 %v908_v14 }
  0x38   :  { %913 = vmatprep.subr.bf16.mxu0 %v912_v17 }
  0x3b   :  { %915 = vmatpush3.bf16.msra.mxu0 %v912_v17 }
  0x3c   :  { %917 = vmatprep.subr.bf16.mxu0 %v916_v21 }
  0xe8   :  { %v710_v46 = vpop.f32.mrb[0].mxu0 }
  0xe9   :  { %v159_v47 = vadd.f32 %v710_v46, %v613_v45  ;;  %v153_v48 = vpop.f32.mrb[1].mxu0 }
  0xea   :  { %v154_v49 = vadd.f32 %v613_v45, %v153_v48 }
  0xec   :  { %967 = vtanh.f32 %v154_v49  ;;  %v713_v50 = vpop.f32.mrb[2].mxu0 }
  0xed   :  { %969 = vtanh.f32 %v159_v47  ;;  %v169_v51 = vadd.f32 %v713_v50, %v613_v45  ;;  %v163_v52 = vpop.f32.mrb[3].mxu0 }
  0xee   :  { %v164_v53 = vadd.f32 %v613_v45, %v163_v52 }
  0xf0   :  { %971 = vtanh.f32 %v164_v53  ;;  %v716_v54 = vpop.f32.mrb[4].mxu0 }
  0xf1   :  { %973 = vtanh.f32 %v169_v51  ;;  %v179_v55 = vadd.f32 %v716_v54, %v613_v45  ;;  %v173_v56 = vpop.f32.mrb[5].mxu0 }
  0xf2   :  { %v174_v57 = vadd.f32 %v613_v45, %v173_v56  ;;  %v481_v56 = vld [vmem:[%s1286_s7 + $0x48] sm:$0xff] }
  0xf4   :  { %975 = vtanh.f32 %v174_v57  ;;  %v719_v58 = vpop.f32.mrb[6].mxu0 }
  0xf5   :  { %977 = vtanh.f32 %v179_v55  ;;  %v189_v59 = vadd.f32 %v719_v58, %v613_v45  ;;  %v183_v60 = vpop.f32.mrb[7].mxu0  ;;  %v480_v55 = vld [vmem:[%s1286_s7 + $0x40] sm:$0xff]  ;;  %v482_v58 = vld [vmem:[%s1286_s7 + $0x50] sm:$0xff] }
  0xf6   :  { %v968_v61 = vpop.eup %967  ;;  %v184_v62 = vadd.f32 %v613_v45, %v183_v60  ;;  %v932_v57 = vpack.c.bf16 %v481_v56, %v480_v55 }
  0xf7   :  { %v970_v63 = vpop.eup %969  ;;  %752 = vmatprep.mubr.f32.mxu1 %v968_v61  ;;  %v484_v61 = vld [vmem:[%s1286_s7 + $0x60] sm:$0xff] }
  0xf8   :  { %979 = vtanh.f32 %v184_v62  ;;  %753 = vmatmul.mubr.f32.vlgmr.msra.gmra.mrb[0].mxu1 %v970_v63  ;;  %v485_v62 = vld [vmem:[%s1286_s7 + $0x68] sm:$0xff] }
  0xf9   :  { %981 = vtanh.f32 %v189_v59  ;;  %956 = vmatpush3.bf16.msra.mxu1 %v916_v21  ;;  %v483_v59 = vld [vmem:[%s1286_s7 + $0x58] sm:$0xff]  ;;  %v940_v63 = vpack.c.bf16 %v485_v62, %v484_v61 }
  0xfa   :  { %v972_v0 = vpop.eup %971  ;;  %949 = vmatprep.subr.bf16.mxu1 %v920_v23  ;;  %v936_v60 = vpack.c.bf16 %v483_v59, %v482_v58 }
  0xfb   :  { %v974_v1 = vpop.eup %973  ;;  %755 = vmatprep.mubr.f32.mxu1 %v972_v0  ;;  %v486_v0 = vld [vmem:[%s1286_s7 + $0x70] sm:$0xff] }
  0xfc   :  { %756 = vmatmul.mubr.f32.gmra.mrb[2].mxu1 %v974_v1  ;;  %v487_v1 = vld [vmem:[%s1286_s7 + $0x78] sm:$0xff] }
  0xfd   :  { %957 = vmatpush3.bf16.msra.mxu1 %v920_v23 }
  0xfe   :  { %v976_v2 = vpop.eup %975  ;;  %950 = vmatprep.subr.bf16.mxu1 %v924_v26 }
  0xff   :  { %v978_v3 = vpop.eup %977  ;;  %758 = vmatprep.mubr.f32.mxu1 %v976_v2  ;;  %v944_v2 = vpack.c.bf16 %v487_v1, %v486_v0 }
 0x100   :  { %759 = vmatmul.mubr.f32.gmra.mrb[4].mxu1 %v978_v3  ;;  %v623_v3 = vld [vmem:[%s1285_s6] ss:$0 sm:$0xff] }
 0x101   :  { %958 = vmatpush3.bf16.msra.mxu1 %v924_v26 }
 0x102   :  { %v980_v4 = vpop.eup %979  ;;  %951 = vmatprep.subr.bf16.mxu1 %v928_v29 }
 0x103   :  { %v982_v5 = vpop.eup %981  ;;  %761 = vmatprep.mubr.f32.mxu1 %v980_v4 }
 0x104   :  { %762 = vmatmul.mubr.f32.gmra.mrb[6].mxu1 %v982_v5 }
 0x105   :  { %959 = vmatpush3.bf16.msra.mxu1 %v928_v29 }
 0x106   :  { %952 = vmatprep.subr.bf16.mxu1 %v932_v57 }
 0x109   :  { %960 = vmatpush3.bf16.msra.mxu1 %v932_v57 }
 0x10a   :  { %953 = vmatprep.subr.bf16.mxu1 %v936_v60 }
 0x10d   :  { %961 = vmatpush3.bf16.msra.mxu1 %v936_v60 }
 0x10e   :  { %954 = vmatprep.subr.bf16.mxu1 %v940_v63 }
 0x111   :  { %962 = vmatpush3.bf16.msra.mxu1 %v940_v63 }
 0x112   :  { %955 = vmatprep.subr.bf16.mxu1 %v944_v2 }
 0x115   :  { %963 = vmatpush3.bf16.msra.mxu1 %v944_v2 }
 0x1cb   :  { %v754_v31 = vpop.f32.mrb[0].mxu1 }
 0x1cc   :  { %v295_v32 = vadd.f32 %v754_v31, %v622_v30  ;;  %v289_v33 = vpop.f32.mrb[1].mxu1 }
 0x1cd   :  { %v290_v34 = vadd.f32 %v622_v30, %v289_v33 }
 0x1cf   :  { %983 = vtanh.f32 %v290_v34  ;;  %v757_v35 = vpop.f32.mrb[2].mxu1 }
 0x1d0   :  { %985 = vtanh.f32 %v295_v32  ;;  %v305_v36 = vadd.f32 %v757_v35, %v622_v30  ;;  %v299_v37 = vpop.f32.mrb[3].mxu1 }
 0x1d1   :  { %v300_v38 = vadd.f32 %v622_v30, %v299_v37 }
 0x1d3   :  { %987 = vtanh.f32 %v300_v38  ;;  %v760_v39 = vpop.f32.mrb[4].mxu1 }
 0x1d4   :  { %989 = vtanh.f32 %v305_v36  ;;  %v315_v40 = vadd.f32 %v760_v39, %v622_v30  ;;  %v309_v41 = vpop.f32.mrb[5].mxu1 }
 0x1d5   :  { %v310_v42 = vadd.f32 %v622_v30, %v309_v41 }
 0x1d7   :  { %991 = vtanh.f32 %v310_v42  ;;  %v763_v43 = vpop.f32.mrb[6].mxu1 }
 0x1d8   :  { %993 = vtanh.f32 %v315_v40  ;;  %v325_v44 = vadd.f32 %v763_v43, %v622_v30  ;;  %v319_v45 = vpop.f32.mrb[7].mxu1 }
 0x1d9   :  { %v984_v46 = vpop.eup %983  ;;  %v320_v47 = vadd.f32 %v622_v30, %v319_v45 }
 0x1da   :  { %v986_v48 = vpop.eup %985  ;;  %796 = vmatprep.mubr.f32.mxu0 %v984_v46 }
 0x1db   :  { %995 = vtanh.f32 %v320_v47  ;;  %797 = vmatmul.mubr.f32.vlgmr.msra.gmra.mrb[8].mxu0 %v986_v48 }
 0x1dc   :  { %997 = vtanh.f32 %v325_v44  ;;  %919 = vmatpush3.bf16.msra.mxu0 %v916_v21 }
 0x1dd   :  { %v988_v49 = vpop.eup %987  ;;  %921 = vmatprep.subr.bf16.mxu0 %v920_v23 }
 0x1de   :  { %v990_v50 = vpop.eup %989  ;;  %799 = vmatprep.mubr.f32.mxu0 %v988_v49 }
 0x1df   :  { %800 = vmatmul.mubr.f32.gmra.mrb[10].mxu0 %v990_v50 }
 0x1e0   :  { %923 = vmatpush3.bf16.msra.mxu0 %v920_v23 }
 0x1e1   :  { %v992_v51 = vpop.eup %991  ;;  %925 = vmatprep.subr.bf16.mxu0 %v924_v26 }
 0x1e2   :  { %v994_v52 = vpop.eup %993  ;;  %802 = vmatprep.mubr.f32.mxu0 %v992_v51 }
 0x1e3   :  { %803 = vmatmul.mubr.f32.gmra.mrb[12].mxu0 %v994_v52 }
 0x1e4   :  { %927 = vmatpush3.bf16.msra.mxu0 %v924_v26 }
 0x1e5   :  { %v996_v53 = vpop.eup %995  ;;  %929 = vmatprep.subr.bf16.mxu0 %v928_v29 }
 0x1e6   :  { %v998_v54 = vpop.eup %997  ;;  %805 = vmatprep.mubr.f32.mxu0 %v996_v53 }
 0x1e7   :  { %806 = vmatmul.mubr.f32.gmra.mrb[14].mxu0 %v998_v54 }
 0x1e8   :  { %931 = vmatpush3.bf16.msra.mxu0 %v928_v29 }
 0x1e9   :  { %933 = vmatprep.subr.bf16.mxu0 %v932_v57 }
 0x1ec   :  { %935 = vmatpush3.bf16.msra.mxu0 %v932_v57 }
 0x1ed   :  { %937 = vmatprep.subr.bf16.mxu0 %v936_v60 }
 0x1f0   :  { %939 = vmatpush3.bf16.msra.mxu0 %v936_v60 }
 0x1f1   :  { %941 = vmatprep.subr.bf16.mxu0 %v940_v63 }
 0x1f4   :  { %943 = vmatpush3.bf16.msra.mxu0 %v940_v63 }
 0x1f5   :  { %945 = vmatprep.subr.bf16.mxu0 %v944_v2 }
 0x1f8   :  { %947 = vmatpush3.bf16.msra.mxu0 %v944_v2 }
 0x2ae   :  { %v798_v4 = vpop.f32.mrb[8].mxu0 }
 0x2af   :  { %v431_v5 = vadd.f32 %v798_v4, %v623_v3  ;;  %v425_v6 = vpop.f32.mrb[9].mxu0 }
 0x2b0   :  { %v426_v7 = vadd.f32 %v623_v3, %v425_v6 }
 0x2b2   :  { %999 = vtanh.f32 %v426_v7  ;;  %v801_v8 = vpop.f32.mrb[10].mxu0 }
 0x2b3   :  { %1001 = vtanh.f32 %v431_v5  ;;  %v441_v9 = vadd.f32 %v801_v8, %v623_v3  ;;  %v435_v10 = vpop.f32.mrb[11].mxu0 }
 0x2b4   :  { %v436_v11 = vadd.f32 %v623_v3, %v435_v10 }
 0x2b6   :  { %1003 = vtanh.f32 %v436_v11  ;;  %v804_v12 = vpop.f32.mrb[12].mxu0 }
 0x2b7   :  { %1005 = vtanh.f32 %v441_v9  ;;  %v451_v13 = vadd.f32 %v804_v12, %v623_v3  ;;  %v445_v14 = vpop.f32.mrb[13].mxu0 }
 0x2b8   :  { %v446_v15 = vadd.f32 %v623_v3, %v445_v14 }
 0x2ba   :  { %1007 = vtanh.f32 %v446_v15  ;;  %v807_v16 = vpop.f32.mrb[14].mxu0 }
 0x2bb   :  { %1009 = vtanh.f32 %v451_v13  ;;  %v461_v17 = vadd.f32 %v807_v16, %v623_v3  ;;  %v455_v18 = vpop.f32.mrb[15].mxu0 }
 0x2bc   :  { %v1000_v19 = vpop.eup %999  ;;  %v456_v20 = vadd.f32 %v623_v3, %v455_v18 }
 0x2bd   :  { %v1002_v21 = vpop.eup %1001  ;;  %840 = vmatprep.mubr.f32.mxu0 %v1000_v19 }
 0x2be   :  { %1011 = vtanh.f32 %v456_v20  ;;  %841 = vmatmul.mubr.f32.vlgmr.msra.gmra.mrb[16].mxu0 %v1002_v21 }
 0x2bf   :  { %1013 = vtanh.f32 %v461_v17 }
 0x2c0   :  { %v1004_v22 = vpop.eup %1003 }
 0x2c1   :  { %v1006_v23 = vpop.eup %1005  ;;  %843 = vmatprep.mubr.f32.mxu1 %v1004_v22 }
 0x2c2   :  { %844 = vmatmul.mubr.f32.vlgmr.msra.gmra.mrb[8].mxu1 %v1006_v23 }
 0x2c4   :  { %v1008_v24 = vpop.eup %1007 }
 0x2c5   :  { %v1010_v25 = vpop.eup %1009  ;;  %846 = vmatprep.mubr.f32.mxu1 %v1008_v24 }
 0x2c6   :  { %847 = vmatmul.mubr.f32.gmra.mrb[10].mxu1 %v1010_v25 }
 0x2c8   :  { %v1012_v26 = vpop.eup %1011 }
 0x2c9   :  { %v1014_v27 = vpop.eup %1013  ;;  %849 = vmatprep.mubr.f32.mxu1 %v1012_v26 }
 0x2ca   :  { %850 = vmatmul.mubr.f32.gmra.mrb[12].mxu1 %v1014_v27 }
 0x391   :  { %v842_v29 = vpop.f32.mrb[16].mxu0 }
 0x392   :  { %v567_v30 = vadd.f32 %v842_v29, %v624_v28  ;;  %v561_v31 = vpop.f32.mrb[17].mxu0 }
 0x393   :  { %v562_v32 = vadd.f32 %v624_v28, %v561_v31 }
 0x394   :  { %601 = vst.msk [vmem:[%s1288_s9 + $0x8] sm:$0xff] %vm62_vm0, %v567_v30 }
 0x395   :  { %600 = vst.msk [vmem:[%s1288_s9] sm:$0xff] %vm62_vm0, %v562_v32  ;;  %v845_v33 = vpop.f32.mrb[8].mxu1 }
 0x396   :  { %v577_v34 = vadd.f32 %v845_v33, %v624_v28  ;;  %v571_v35 = vpop.f32.mrb[9].mxu1 }
 0x397   :  { %v572_v36 = vadd.f32 %v624_v28, %v571_v35 }
 0x398   :  { %603 = vst.msk [vmem:[%s1288_s9 + $0x18] sm:$0xff] %vm62_vm0, %v577_v34 }
 0x399   :  { %602 = vst.msk [vmem:[%s1288_s9 + $0x10] sm:$0xff] %vm62_vm0, %v572_v36  ;;  %v848_v37 = vpop.f32.mrb[10].mxu1 }
 0x39a   :  { %v587_v38 = vadd.f32 %v848_v37, %v624_v28  ;;  %v581_v39 = vpop.f32.mrb[11].mxu1 }
 0x39b   :  { %v582_v40 = vadd.f32 %v624_v28, %v581_v39 }
 0x39c   :  { %605 = vst.msk [vmem:[%s1288_s9 + $0x28] sm:$0xff] %vm62_vm0, %v587_v38 }
 0x39d   :  { %604 = vst.msk [vmem:[%s1288_s9 + $0x20] sm:$0xff] %vm62_vm0, %v582_v40  ;;  %v851_v41 = vpop.f32.mrb[12].mxu1 }
 0x39e   :  { %v597_v42 = vadd.f32 %v851_v41, %v624_v28  ;;  %v591_v43 = vpop.f32.mrb[13].mxu1 }
 0x39f   :  { %v592_v44 = vadd.f32 %v624_v28, %v591_v43 }
 0x3a0   :  { %607 = vst.msk [vmem:[%s1288_s9 + $0x38] sm:$0xff] %vm62_vm0, %v597_v42 }
 0x3a1   :  { %606 = vst.msk [vmem:[%s1288_s9 + $0x30] sm:$0xff] %vm62_vm0, %v592_v44 }
 0x3a2   :  { %612 = vsyncpa [#allocation3], 1 }

</bundles_post_ra>
